<compile_context>
chip_gen: v7x
topology: tpu7x:2x2x1
jax: 0.10.0
libtpu: 0.0.40
codegen_flags: <defaults>
</compile_context>

<pallas_src>
import numpy as np
import jax
import jax.numpy as jnp
from jax.experimental import pallas as pl
from jax.experimental.pallas import tpu as pltpu


TAG_PAD = 128      # lane-dense classifier output width
NSPK_PAD = 16      # one-hot speaker block width (9 speakers -> 16)
LANE = 128         # pad every contraction / output dim to this


def _round_up(x, m):
    return ((x + m - 1) // m) * m


def _cdiv(a, b):
    return (a + b - 1) // b


# ----------------------------------------------------------------------------
# Fused kernel: one [TN,K]@[K,3g] matmul (encoder + speaker one-hot folded in),
# classifier lin1+ReLU+lin2, log_softmax.  Row-tiled over the node dimension.
# ----------------------------------------------------------------------------
def _fused_forward_kernel(x_ref, wenc_ref, benc_ref,
                          w1_ref, b1_ref, w2_ref, b2_ref,
                          logp_ref):
    x = x_ref[...]                                            # [TN, K] bf16

    # Encoder + speaker embedding in ONE matmul (speaker table is stacked
    # below the block-diagonal weight; x carries the one-hot speaker block).
    enc = (jnp.dot(x, wenc_ref[...], preferred_element_type=jnp.float32)
           + benc_ref[...])                                   # [TN, 3g_pad] f32

    # Classifier: lin1 -> ReLU -> lin2 (dropout is identity in eval mode).
    hid = jnp.maximum(
        jnp.dot(enc.astype(jnp.bfloat16), w1_ref[...],
                preferred_element_type=jnp.float32) + b1_ref[...], 0.0)
    logits = (jnp.dot(hid.astype(jnp.bfloat16), w2_ref[...],
                      preferred_element_type=jnp.float32)
              + b2_ref[...])                                  # [TN, TAG_PAD] f32

    # log_softmax.  Padded tag lanes carry a -1e30 bias -> exp underflows to 0,
    # so they influence neither the max nor the sum.
    m = jnp.max(logits, axis=-1, keepdims=True)
    z = logits - m
    lse = jnp.log(jnp.sum(jnp.exp(z), axis=-1, keepdims=True))
    logp_ref[...] = (z - lse).astype(logp_ref.dtype)


# ----------------------------------------------------------------------------
# One-time host-side repacking of parameters into the fused-kernel layout.
# ----------------------------------------------------------------------------
def prepare_params(params):
    W_a, W_t, W_v = params["W_a"], params["W_t"], params["W_v"]
    a_dim, g = W_a.shape
    t_dim, v_dim = W_t.shape[0], W_v.shape[0]
    dcat = a_dim + t_dim + v_dim
    g3 = 3 * g
    h = params["W1"].shape[1]
    tag = params["W2"].shape[1]

    k_in = dcat + NSPK_PAD                       # features + one-hot speakers
    k_pad = _round_up(k_in, LANE)
    g3_pad = _round_up(g3, LANE)
    h_pad = _round_up(h, LANE)

    # Block-diagonal encoder weight with the speaker table stacked below,
    # zero-padded to [k_pad, g3_pad].
    wenc = jnp.zeros((k_pad, g3_pad), jnp.float32)
    wenc = wenc.at[:a_dim, :g].set(W_a)
    wenc = wenc.at[a_dim:a_dim + t_dim, g:2 * g].set(W_t)
    wenc = wenc.at[a_dim + t_dim:dcat, 2 * g:g3].set(W_v)
    spk = params["spk_table"]                                  # [n_spk, g]
    spk3 = jnp.tile(spk, (1, 3))                               # [n_spk, 3g]
    wenc = wenc.at[dcat:dcat + spk.shape[0], :g3].set(spk3)

    benc = jnp.zeros((1, g3_pad), jnp.float32).at[:, :g3].set(
        jnp.concatenate([params["b_a"], params["b_t"], params["b_v"]], axis=-1))

    # Classifier lin1 / lin2, zero/row-padded; padded tag lanes get bias -1e30.
    w1 = jnp.zeros((g3_pad, h_pad), jnp.float32).at[:g3, :h].set(params["W1"])
    b1 = jnp.zeros((1, h_pad), jnp.float32).at[:, :h].set(params["b1"])
    w2 = jnp.zeros((h_pad, TAG_PAD), jnp.float32).at[:h, :tag].set(params["W2"])
    b2 = jnp.full((1, TAG_PAD), -1e30, jnp.float32).at[:, :tag].set(params["b2"])

    return dict(wenc=wenc.astype(jnp.bfloat16), benc=benc,
                w1=w1.astype(jnp.bfloat16), b1=b1,
                w2=w2.astype(jnp.bfloat16), b2=b2,
                tag=tag, dcat=dcat, k_pad=k_pad,
                g3_pad=g3_pad, h_pad=h_pad)


def _fused_call(prep, x, tn):
    n_pad, k_pad = x.shape
    g3_pad, h_pad = prep["g3_pad"], prep["h_pad"]

    row = lambda c: pl.BlockSpec((tn, c), lambda i: (i, 0))          # tiled
    resident = lambda r, c: pl.BlockSpec((r, c), lambda i: (0, 0))   # VMEM-resident

    return pl.pallas_call(
        _fused_forward_kernel,
        out_shape=jax.ShapeDtypeStruct((n_pad, TAG_PAD), jnp.float32),
        grid=(n_pad // tn,),
        in_specs=[row(k_pad),
                  resident(k_pad, g3_pad), resident(1, g3_pad),
                  resident(g3_pad, h_pad), resident(1, h_pad),
                  resident(h_pad, TAG_PAD), resident(1, TAG_PAD)],
        out_specs=row(TAG_PAD),
        compiler_params=pltpu.CompilerParams(
            dimension_semantics=("parallel",)),
    )(x, prep["wenc"], prep["benc"],
      prep["w1"], prep["b1"], prep["w2"], prep["b2"])


def _pick_tile(n):
    """Row tile: multiple of 8, capped at 2048, >=2 grid steps when possible
    so v7x's two TensorCores both get work via the 'parallel' row axis."""
    n8 = _round_up(max(n, 1), 8)
    if n8 <= 8:
        return n8
    return min(2048, _round_up(_cdiv(n8, 2), 8))


# ----------------------------------------------------------------------------
# Full forward (all hot math in the single fused kernel).
# ----------------------------------------------------------------------------
def corect_forward(params, audio, text, visual, speaker, lengths_py, seq_len):
    B = audio.shape[0]
    N = B * seq_len
    prep = prepare_params(params)

    # Feature-concatenate the modalities + one-hot speaker block, pad the
    # feature axis to k_pad, cast to bf16 once (matches packed-weight layout).
    spk_ids = speaker.reshape(N, 1).astype(jnp.int32)
    onehot = (spk_ids == jnp.arange(NSPK_PAD, dtype=jnp.int32)[None, :]
              ).astype(jnp.float32)                            # [N, NSPK_PAD]
    x = jnp.concatenate(
        [audio.reshape(N, -1), text.reshape(N, -1), visual.reshape(N, -1),
         onehot], axis=-1).astype(jnp.float32)                 # [N, dcat+NSPK_PAD]
    k_in = x.shape[1]
    if k_in != prep["k_pad"]:
        x = jnp.pad(x, ((0, 0), (0, prep["k_pad"] - k_in)))

    tn = _pick_tile(N)
    n_pad = _round_up(N, tn)
    if n_pad != N:
        # Padded rows are all-zero (one-hot block zero too) and never selected.
        x = jnp.pad(x, ((0, n_pad - N), (0, 0)))
    x = x.astype(jnp.bfloat16)

    logp_full = _fused_call(prep, x, tn)                       # [n_pad, TAG_PAD]

    # feature_packing + multi_concat row selection (host-side lengths, like
    # .item() in the reference) applied to the tiny kernel output.
    idx = np.concatenate(
        [np.arange(l) + j * seq_len for j, l in enumerate(lengths_py)]
    ).astype(np.int32)
    idx = jnp.asarray(idx)

    log_prob = logp_full[idx, :prep["tag"]]        # drop lane padding, gather rows
    y_hat = jnp.argmax(log_prob, axis=-1).astype(jnp.int32)   # tiny, done outside
    return y_hat, log_prob


# ----------------------------------------------------------------------------
# Deterministic synthetic parameters & inputs
# ----------------------------------------------------------------------------
if __name__ == "__main__":
    # small shapes
    B, S = 2, 8
    a_dim, t_dim, v_dim = 20, 32, 24
    g_dim = 32                    # hidden_size (g_dim == h_dim)
    n_modals = 3
    ic_dim = g_dim * n_modals     # no_gnn & no crossmodal branch
    tag_size = 3
    n_speakers = 9

    key = jax.random.PRNGKey(0)
    ks = jax.random.split(key, 16)

    def init(k, shape, scale=0.05):
        return (scale * jax.random.normal(k, shape)).astype(jnp.float32)

    params = {
        "W_a": init(ks[0], (a_dim, g_dim)),
        "b_a": init(ks[1], (1, g_dim)),
        "W_t": init(ks[2], (t_dim, g_dim)),
        "b_t": init(ks[3], (1, g_dim)),
        "W_v": init(ks[4], (v_dim, g_dim)),
        "b_v": init(ks[5], (1, g_dim)),
        "spk_table": init(ks[6], (n_speakers, g_dim)),
        "W1": init(ks[7], (ic_dim, g_dim)),
        "b1": init(ks[8], (1, g_dim)),
        "W2": init(ks[9], (g_dim, tag_size)),
        "b2": init(ks[10], (1, tag_size)),
    }

    audio = init(ks[11], (B, S, a_dim), scale=1.0)
    text = init(ks[12], (B, S, t_dim), scale=1.0)
    visual = init(ks[13], (B, S, v_dim), scale=1.0)
    speaker = jax.random.randint(ks[14], (B, S), 0, n_speakers, dtype=jnp.int32)
    lengths_py = [8, 6]           # text_len_tensor (host-side, like .item())

    y_hat, log_prob = corect_forward(params, audio, text, visual, speaker,
                                     lengths_py, S)
    jax.block_until_ready((y_hat, log_prob))

    assert y_hat.shape == (sum(lengths_py),)
    assert log_prob.shape == (sum(lengths_py), tag_size)
    assert bool(jnp.all(jnp.isfinite(log_prob)))
    assert bool(jnp.all((y_hat >= 0) & (y_hat < tag_size)))
    print("KERNEL_OK")
</pallas_src>

<mosaic_0001>
module attributes {stable_mosaic.version = 11 : i64} {
  func.func @_fused_forward_kernel(%arg0: i32, %arg1: memref<8x128xbf16, #tpu.memory_space<vmem>>, %arg2: memref<128x128xbf16, #tpu.memory_space<vmem>>, %arg3: memref<1x128xf32, #tpu.memory_space<vmem>>, %arg4: memref<128x128xbf16, #tpu.memory_space<vmem>>, %arg5: memref<1x128xf32, #tpu.memory_space<vmem>>, %arg6: memref<128x128xbf16, #tpu.memory_space<vmem>>, %arg7: memref<1x128xf32, #tpu.memory_space<vmem>>, %arg8: memref<8x128xf32, #tpu.memory_space<vmem>>) attributes {dimension_semantics = [#tpu.dimension_semantics<parallel>], iteration_bounds = array<i64: 2>, scalar_prefetch = 0 : i64, scratch_operands = 0 : i64, tpu.core_type = #tpu.core_type<tc>, window_params = [{transform_indices = @transform_0, window_bounds = array<i64: 8, 128>}, {pipeline_mode = #tpu.pipeline_mode<synchronous>, transform_indices = @transform_1, window_bounds = array<i64: 128, 128>}, {pipeline_mode = #tpu.pipeline_mode<synchronous>, transform_indices = @transform_2, window_bounds = array<i64: 1, 128>}, {pipeline_mode = #tpu.pipeline_mode<synchronous>, transform_indices = @transform_3, window_bounds = array<i64: 128, 128>}, {pipeline_mode = #tpu.pipeline_mode<synchronous>, transform_indices = @transform_4, window_bounds = array<i64: 1, 128>}, {pipeline_mode = #tpu.pipeline_mode<synchronous>, transform_indices = @transform_5, window_bounds = array<i64: 128, 128>}, {pipeline_mode = #tpu.pipeline_mode<synchronous>, transform_indices = @transform_6, window_bounds = array<i64: 1, 128>}, {transform_indices = @transform_7, window_bounds = array<i64: 8, 128>}]} {
    %c0 = arith.constant 0 : index
    %c0_0 = arith.constant 0 : index
    %0 = vector.load %arg1[%c0, %c0_0] : memref<8x128xbf16, #tpu.memory_space<vmem>>, vector<8x128xbf16>
    %c0_1 = arith.constant 0 : index
    %c0_2 = arith.constant 0 : index
    %1 = vector.load %arg2[%c0_1, %c0_2] : memref<128x128xbf16, #tpu.memory_space<vmem>>, vector<128x128xbf16>
    %cst = arith.constant dense<0.000000e+00> : vector<8x128xf32>
    %2 = tpu.matmul %0, %1, %cst {dimension_numbers = #tpu.dot_dimension_numbers<[1], [0], [0], [1], [0, 0, 1, 1], [], []>} : vector<8x128xbf16>, vector<128x128xbf16>, vector<8x128xf32> -> vector<8x128xf32>
    %c0_3 = arith.constant 0 : index
    %c0_4 = arith.constant 0 : index
    %3 = vector.load %arg3[%c0_3, %c0_4] : memref<1x128xf32, #tpu.memory_space<vmem>>, vector<1x128xf32>
    %4 = vector.broadcast %3 : vector<1x128xf32> to vector<8x128xf32>
    %5 = arith.addf %2, %4 : vector<8x128xf32>
    %6 = arith.truncf %5 : vector<8x128xf32> to vector<8x128xbf16>
    %c0_5 = arith.constant 0 : index
    %c0_6 = arith.constant 0 : index
    %7 = vector.load %arg4[%c0_5, %c0_6] : memref<128x128xbf16, #tpu.memory_space<vmem>>, vector<128x128xbf16>
    %cst_7 = arith.constant dense<0.000000e+00> : vector<8x128xf32>
    %8 = tpu.matmul %6, %7, %cst_7 {dimension_numbers = #tpu.dot_dimension_numbers<[1], [0], [0], [1], [0, 0, 1, 1], [], []>} : vector<8x128xbf16>, vector<128x128xbf16>, vector<8x128xf32> -> vector<8x128xf32>
    %c0_8 = arith.constant 0 : index
    %c0_9 = arith.constant 0 : index
    %9 = vector.load %arg5[%c0_8, %c0_9] : memref<1x128xf32, #tpu.memory_space<vmem>>, vector<1x128xf32>
    %10 = vector.broadcast %9 : vector<1x128xf32> to vector<8x128xf32>
    %11 = arith.addf %8, %10 : vector<8x128xf32>
    %cst_10 = arith.constant 0.000000e+00 : f32
    %12 = vector.broadcast %cst_10 : f32 to vector<8x128xf32>
    %13 = arith.maximumf %11, %12 : vector<8x128xf32>
    %14 = arith.truncf %13 : vector<8x128xf32> to vector<8x128xbf16>
    %c0_11 = arith.constant 0 : index
    %c0_12 = arith.constant 0 : index
    %15 = vector.load %arg6[%c0_11, %c0_12] : memref<128x128xbf16, #tpu.memory_space<vmem>>, vector<128x128xbf16>
    %cst_13 = arith.constant dense<0.000000e+00> : vector<8x128xf32>
    %16 = tpu.matmul %14, %15, %cst_13 {dimension_numbers = #tpu.dot_dimension_numbers<[1], [0], [0], [1], [0, 0, 1, 1], [], []>} : vector<8x128xbf16>, vector<128x128xbf16>, vector<8x128xf32> -> vector<8x128xf32>
    %c0_14 = arith.constant 0 : index
    %c0_15 = arith.constant 0 : index
    %17 = vector.load %arg7[%c0_14, %c0_15] : memref<1x128xf32, #tpu.memory_space<vmem>>, vector<1x128xf32>
    %18 = vector.broadcast %17 : vector<1x128xf32> to vector<8x128xf32>
    %19 = arith.addf %16, %18 : vector<8x128xf32>
    %cst_16 = arith.constant dense<0xFF800000> : vector<8xf32>
    %20 = vector.multi_reduction <maximumf>, %19, %cst_16 [1] : vector<8x128xf32> to vector<8xf32>
    %21 = vector.shape_cast %20 : vector<8xf32> to vector<8x1xf32>
    %22 = vector.broadcast %21 : vector<8x1xf32> to vector<8x128xf32>
    %23 = arith.subf %19, %22 : vector<8x128xf32>
    %24 = math.exp %23 : vector<8x128xf32>
    %cst_17 = arith.constant dense<0.000000e+00> : vector<8xf32>
    %25 = vector.multi_reduction <add>, %24, %cst_17 [1] : vector<8x128xf32> to vector<8xf32>
    %26 = vector.shape_cast %25 : vector<8xf32> to vector<8x1xf32>
    %27 = math.log %26 : vector<8x1xf32>
    %28 = vector.broadcast %27 : vector<8x1xf32> to vector<8x128xf32>
    %29 = arith.subf %23, %28 : vector<8x128xf32>
    %c0_18 = arith.constant 0 : index
    %c0_19 = arith.constant 0 : index
    %30 = vector.load %arg8[%c0_18, %c0_19] : memref<8x128xf32, #tpu.memory_space<vmem>>, vector<8x128xf32>
    tpu.vector_store %arg8[%c0_18, %c0_19], %29 {strides = array<i32>} : memref<8x128xf32, #tpu.memory_space<vmem>>, vector<8x128xf32>,
    return
  }
  func.func @transform_0(%arg0: i32) -> (i32, i32) {
    %c0_i32 = arith.constant 0 : i32
    %c0_i32_0 = arith.constant 0 : i32
    return %arg0, %c0_i32 : i32, i32
  }
  func.func @transform_1(%arg0: i32) -> (i32, i32) {
    %c0_i32 = arith.constant 0 : i32
    %c0_i32_0 = arith.constant 0 : i32
    %c0_i32_1 = arith.constant 0 : i32
    return %c0_i32, %c0_i32_0 : i32, i32
  }
  func.func @transform_2(%arg0: i32) -> (i32, i32) {
    %c0_i32 = arith.constant 0 : i32
    %c0_i32_0 = arith.constant 0 : i32
    %c0_i32_1 = arith.constant 0 : i32
    return %c0_i32, %c0_i32_0 : i32, i32
  }
  func.func @transform_3(%arg0: i32) -> (i32, i32) {
    %c0_i32 = arith.constant 0 : i32
    %c0_i32_0 = arith.constant 0 : i32
    %c0_i32_1 = arith.constant 0 : i32
    return %c0_i32, %c0_i32_0 : i32, i32
  }
  func.func @transform_4(%arg0: i32) -> (i32, i32) {
    %c0_i32 = arith.constant 0 : i32
    %c0_i32_0 = arith.constant 0 : i32
    %c0_i32_1 = arith.constant 0 : i32
    return %c0_i32, %c0_i32_0 : i32, i32
  }
  func.func @transform_5(%arg0: i32) -> (i32, i32) {
    %c0_i32 = arith.constant 0 : i32
    %c0_i32_0 = arith.constant 0 : i32
    %c0_i32_1 = arith.constant 0 : i32
    return %c0_i32, %c0_i32_0 : i32, i32
  }
  func.func @transform_6(%arg0: i32) -> (i32, i32) {
    %c0_i32 = arith.constant 0 : i32
    %c0_i32_0 = arith.constant 0 : i32
    %c0_i32_1 = arith.constant 0 : i32
    return %c0_i32, %c0_i32_0 : i32, i32
  }
  func.func @transform_7(%arg0: i32) -> (i32, i32) {
    %c0_i32 = arith.constant 0 : i32
    %c0_i32_0 = arith.constant 0 : i32
    return %arg0, %c0_i32 : i32, i32
  }
}

</mosaic_0001>

<bundles_post_ra>
// kernel: tpu_custom_call.1
= control target key start
LH: loop header
LB: loop body
LE: loop exit
PB: predicated region body
PF: predicated region fallthrough
CT: control target
= control target key end

     0   :  { %12 = vsyncpa [#allocation3], 0  ;;  %s1586_s0 = inlined_call_operand.hbm [shape: bf16[16,128], index: 0, kind: input, shape index: {}]   ;;  %s1587_s1 = inlined_call_operand.hbm [shape: bf16[128,128], index: 1, kind: input, shape index: {}]   ;;  %s1588_s2 = inlined_call_operand.vmem [shape: f32[1,128], index: 2, kind: input, shape index: {}]   ;;  %s1589_s3 = inlined_call_operand.hbm [shape: bf16[128,128], index: 3, kind: input, shape index: {}]   ;;  %s1590_s4 = inlined_call_operand.vmem [shape: f32[1,128], index: 4, kind: input, shape index: {}]   ;;  %s1591_s5 = inlined_call_operand.hbm [shape: bf16[128,128], index: 5, kind: input, shape index: {}]   ;;  %s1592_s6 = inlined_call_operand.vmem [shape: f32[1,128], index: 6, kind: input, shape index: {}]   ;;  %s1593_s7 = inlined_call_operand.hbm [shape: f32[16,128], index: 7, kind: output, shape index: {}]  }
   0x1   :  { %14 = vsyncpa [#allocation3 + $0x1], 0 }
   0x2   :  { %15 = vsyncpa [#allocation6], 0 }
   0x3   :  { %16 = vsyncpa [#allocation9], 0 }
   0x4   :  { %17 = vsyncpa [#allocation4], 0 }
   0x5   :  { %19 = vsyncpa [#allocation4 + $0x1], 0  ;;  %s1280_s24 = smov 0   ;;  %s1282_s25 = smov 0  }
   0x6   :  { %s1284_s26 = smov 0   ;;  %s1286_s27 = smov 0  }
   0x7 LB: > { %s1301_s28 = sadd.s32 4294967295, %s1229_s27   ;;  %s800_s29 = sadd.s32 4294967294, %s1229_s27   ;;  %s1229_s27 = sphi %s1286_s27, %s1619_s27   ;;  %s1225_s26 = sphi %s1284_s26, %s1618_s26   ;;  %s1221_s25 = sphi %s1282_s25, %s1617_s25   ;;  %s1217_s24 = sphi %s1280_s24, %s1616_s24  }
   0x8   : > { %p45_p0 = scmp.ne.s32.totalorder %s1221_s25, %s1217_s24  ;;  %p1594_p1 = scmp.eq.s32.totalorder %s1301_s28, 0 }
   0x9   : > { %p201_p3 = scmp.eq.s32.totalorder %s800_s29, 1  ;;  %p801_p5 = scmp.ge.s32.totalorder %s1229_s27, 1 }
   0xa   : > { %p1310_p4 = por %p1594_p1, %p45_p0  ;;  %p208_p7 = scmp.lt.s32.totalorder %s1229_s27, 3 }
   0xb   : > { %p1315_p6 = por %p201_p3, %p45_p0  ;;  %s1231_s10 = smov [#allocation5]  }
   0xc   : > { %s1598_s30 = scalar_select %p1310_p4, 1, 0 }
   0xd   : > { %s1599_s8 = scalar_select %p1315_p6, 1, 0 }
   0xe   : > { %p1320_p8 = pnand %p801_p5, %p208_p7  ;;  %s220_s11 = sshll.u32 %s1231_s10, 4  ;;  %s1324_s11 = int_to_ptr.vmem [resolvable:$true] %s220_s11 }
   0xf   : > { %1600 = sst [smem:[#allocation15_spill]] %s1599_s8  ;;  %s1232_s13 = smov [#allocation7]  }
  0x10   : > { %s1601_s9 = scalar_select %p1320_p8, 1, 0 }
  0x11   : > { %p948_p9 = pneg %p1320_p8  ;;  %s236_s14 = sshll.u32 %s1232_s13, 4  ;;  %s1335_s14 = int_to_ptr.vmem [resolvable:$true] %s236_s14 }
  0x12   : > { %s1233_s15 = smov [#allocation8]   ;;  %s1041_s19 = scalar_lea.hbm %s1587_s1, 1024 }
  0x13   : > { %p1331_p11 = pnand %p948_p9, %p1594_p1  ;;  %s1337_s16 = sshll.u32 %s1233_s15, 4  ;;  %s253_s16 = int_to_ptr.vmem [resolvable:$true] %s1337_s16 }
  0x14   : > { %p1042_p12 = scmp.ne.s32.totalorder %s1587_s1, %s1041_s19  ;;  %p1048_p5 = scmp.lt.u32.totalorder %s1041_s19, %s1587_s1 }
  0x15   : > { %p1347_p13 = pneg %p1331_p11 }
  0x17   : > { %p1044_p0 = pnand %p1347_p13, %p1042_p12 }
  0x19   : > { %p1045_p3 = pneg %p1044_p0 }
  0x1b   : > { %p1050_p7 = pnand %p1048_p5, %p1045_p3 }
  0x1d   : > { %1053 = shalt.err (!%p1050_p7)
}
  0x1e   : > { %s1054_s10 = scalar_lea.vmem %s1324_s11, 1024  ;;  %p1062_p2 = scmp.lt.s32.totalorder %s1324_s11, %s1324_s11 }
  0x1f   : > { %p1055_p9 = scmp.ne.s32.totalorder %s1324_s11, %s1054_s10  ;;  %p1063_p6 = scmp.lt.s32.totalorder %s1054_s10, %s1054_s10 }
  0x21   : > { %p1057_p10 = pnand %p1055_p9, %p1347_p13  ;;  %p1064_p12 = por %p1063_p6, %p1062_p2 }
  0x23   : > { %p1058_p1 = pneg %p1057_p10 }
  0x25   : > { %p1065_p0 = pnand %p1064_p12, %p1058_p1 }
  0x27   : > { %1068 = shalt.err (!%p1065_p0)
}
  0x28   : > { %s1234_s13 = smov 64   ;;  %s1235_s15 = smov 4  }
  0x29   : > { %951 = dma.hbm_to_vmem [thread:$0]  (!%p1331_p11), %s1587_s1, 1024, %s1324_s11, [#allocation6], %s1234_s13, %s1234_s13, %s1235_s15  }
  0x2a   : > { %s1069_s21 = scalar_lea.hbm %s1589_s3, 1024 }
  0x2b   : > { %p1070_p1 = scmp.ne.s32.totalorder %s1589_s3, %s1069_s21  ;;  %p1076_p10 = scmp.lt.u32.totalorder %s1069_s21, %s1589_s3 }
  0x2d   : > { %p1072_p2 = pnand %p1070_p1, %p1347_p13 }
  0x2f   : > { %p1073_p6 = pneg %p1072_p2 }
  0x31   : > { %p1078_p3 = pnand %p1076_p10, %p1073_p6 }
  0x33   : > { %1081 = shalt.err (!%p1078_p3)
}
  0x34   : > { %s1082_s11 = scalar_lea.vmem %s1335_s14, 1024  ;;  %p1090_p12 = scmp.lt.s32.totalorder %s1335_s14, %s1335_s14 }
  0x35   : > { %p1083_p5 = scmp.ne.s32.totalorder %s1335_s14, %s1082_s11  ;;  %p1091_p0 = scmp.lt.s32.totalorder %s1082_s11, %s1082_s11 }
  0x37   : > { %p1085_p7 = pnand %p1083_p5, %p1347_p13  ;;  %p1092_p1 = por %p1091_p0, %p1090_p12 }
  0x39   : > { %p1086_p9 = pneg %p1085_p7 }
  0x3b   : > { %p1093_p2 = pnand %p1092_p1, %p1086_p9 }
  0x3d   : > { %1096 = shalt.err (!%p1093_p2)
}
  0x3e   : > { %954 = dma.hbm_to_vmem [thread:$0]  (!%p1331_p11), %s1589_s3, 1024, %s1335_s14, [#allocation6], %s1234_s13, %s1234_s13, %s1235_s15  }
  0x3f   : > { %s1097_s20 = scalar_lea.hbm %s1591_s5, 1024 }
  0x40   : > { %p1098_p6 = scmp.ne.s32.totalorder %s1591_s5, %s1097_s20  ;;  %p1104_p5 = scmp.lt.u32.totalorder %s1097_s20, %s1591_s5 }
  0x42   : > { %p1100_p10 = pnand %p1098_p6, %p1347_p13 }
  0x44   : > { %p1101_p3 = pneg %p1100_p10 }
  0x46   : > { %p1106_p7 = pnand %p1104_p5, %p1101_p3 }
  0x48   : > { %1109 = shalt.err (!%p1106_p7)
}
  0x49   : > { %s1110_s11 = scalar_lea.vmem %s253_s16, 1024  ;;  %p1118_p1 = scmp.lt.s32.totalorder %s253_s16, %s253_s16 }
  0x4a   : > { %p1111_p9 = scmp.ne.s32.totalorder %s253_s16, %s1110_s11  ;;  %p1119_p2 = scmp.lt.s32.totalorder %s1110_s11, %s1110_s11 }
  0x4c   : > { %p1113_p12 = pnand %p1111_p9, %p1347_p13  ;;  %p1120_p4 = por %p1119_p2, %p1118_p1 }
  0x4e   : > { %p1114_p0 = pneg %p1113_p12 }
  0x50   : > { %p1121_p8 = pnand %p1120_p4, %p1114_p0 }
  0x52   : > { %1124 = shalt.err (!%p1121_p8)
}
  0x53   : > { %957 = dma.hbm_to_vmem [thread:$0]  (!%p1331_p11), %s1591_s5, 1024, %s253_s16, [#allocation9], %s1234_s13, %s1234_s13, %s1235_s15  }
  0x54   : > { %s1420_s22 = sadd.s32 1, %s1229_s27   ;;  %s32_s17 = sadd.s32 1, %s1225_s26 }
  0x55   : > { %s29_s12 = ssub.s32 %s1229_s27, %s1420_s22  ;;  %p39_p8 = scmp.ne.s32.totalorder %s1225_s26, %s1221_s25 }
  0x56   : > { %p30_p4 = scmp.eq.s32.totalorder %s29_s12, 0  ;;  %p40_p13 = scmp.eq.s32.totalorder %s1229_s27, 0 }
  0x57   : > { %p969_p6 = scmp.lt.s32.totalorder %s1229_s27, 2  ;;  %p1604_p3 = scmp.eq.s32.totalorder %s1301_s28, 1 }
  0x58   : > { %s1430_s18 = scalar_select %p30_p4, %s1225_s26, %s32_s17  }
  0x59   : > { %p41_p10 = por %p40_p13, %p39_p8  ;;  %p1434_p5 = por %p1604_p3, %p39_p8 }
  0x5a   : > { %s269_s20 = sand.u32 1, %s1225_s26   ;;  %s807_s21 = sshll.u32 %s1229_s27, 6 }
  0x5b   : > { %s806_s16 = sshll.u32 %s269_s20, 2  ;;  %s1443_s23 = scalar_lea.hbm %s1586_s0, %s807_s21 }
  0x5c   : > { %s273_s29 = scalar_lea.vmem [#allocation2], %s806_s16  ;;  %p1445_p11 = pnand %p969_p6, %p41_p10 }
  0x5d   : > { %s280_s10 = sshll.u32 %s273_s29, 4  ;;  %s270_s14 = scalar_lea.sflag [#allocation3], %s269_s20  ;;  %s1449_s10 = int_to_ptr.vmem [resolvable:$true] %s280_s10 }
  0x5e   : > { %s1125_s8 = scalar_lea.hbm %s1443_s23, 64  ;;  %p1127_p9 = pneg %p1445_p11 }
  0x5f   : > { %p1126_p7 = scmp.ne.s32.totalorder %s1443_s23, %s1125_s8  ;;  %s1130_s21 = scalar_lea.hbm %s1586_s0, 128 }
  0x60   : > { %p1131_p1 = scmp.lt.u32.totalorder %s1443_s23, %s1586_s0  ;;  %p1132_p2 = scmp.lt.u32.totalorder %s1130_s21, %s1125_s8 }
  0x61   : > { %p1128_p12 = pnand %p1127_p9, %p1126_p7  ;;  %p1134_p8 = scmp.lt.u32.totalorder %s1125_s8, %s1443_s23 }
  0x62   : > { %p1133_p4 = por %p1132_p2, %p1131_p1 }
  0x63   : > { %p1129_p0 = pneg %p1128_p12 }
  0x64   : > { %p1135_p13 = por %p1134_p8, %p1133_p4 }
  0x66   : > { %p1136_p6 = pnand %p1135_p13, %p1129_p0 }
  0x68   : > { %1139 = shalt.err (!%p1136_p6)
}
  0x69   : > { %s1140_s20 = scalar_lea.vmem %s1449_s10, 64  ;;  %s1236_s15 = smov [#allocation2]  }
  0x6a   : > { %p1141_p10 = scmp.ne.s32.totalorder %s1449_s10, %s1140_s20  ;;  %s1145_s29 = sshll.u32 %s1236_s15, 4  ;;  %s1146_s29 = int_to_ptr.vmem [resolvable:$false] %s1145_s29 }
  0x6b   : > { %s1147_s12 = scalar_lea.vmem %s1146_s29, 128  ;;  %p1148_p12 = scmp.lt.s32.totalorder %s1449_s10, %s1146_s29 }
  0x6c   : > { %p1143_p3 = pnand %p1141_p10, %p1127_p9  ;;  %p1149_p1 = scmp.lt.s32.totalorder %s1147_s12, %s1140_s20 }
  0x6e   : > { %p1144_p7 = pneg %p1143_p3  ;;  %p1150_p2 = por %p1149_p1, %p1148_p12 }
  0x70   : > { %p1151_p4 = pnand %p1150_p2, %p1144_p7 }
  0x72   : > { %1154 = shalt.err (!%p1151_p4)
}
  0x73   : > { %961 = dma.hbm_to_vmem [thread:$0]  (!%p1445_p11), %s1443_s23, 64, %s1449_s10, %s270_s14  }
  0x74   : > { %p1607_p0 = scmp.ne.s32.totalorder %s1601_s9, 0 }
  0x75   : > { %s1479_s8 = sand.u32 (!%p1607_p0), 1, %s1221_s25   ;;  %p1608_p9 = scmp.ne.s32.totalorder (!%p1607_p0), %s1598_s30, 0 }
  0x76   : > { %289 = sbr.rel (%p1607_p0) target bundleno = 1143 (0x477), region = 48  ;;  %s809_s17 = sshll.u32 (!%p1607_p0), %s1479_s8, 2 }
  0x77   : > { %s292_s21 = scalar_lea.sflag (!%p1607_p0), [#allocation3], %s1479_s8  ;;  %s1483_s16 = scalar_lea.vmem (!%p1607_p0), [#allocation2], %s809_s17 }
  0x7d   : > { %1200 = dma.done.wait (%p1608_p9), %s292_s21, 64  }
  0x7e   : > { %1202 = vsyncadd (%p1608_p9), %s292_s21, 4294967232  ;;  %p1609_p11 = scmp.eq.s32.totalorder %s1301_s28, 0 }
  0x80   : > { %1204 = dma.done.wait (%p1609_p11), [#allocation6], 2048   ;;  %p1610_p8 = pmov %p1609_p11 }
  0x82   : > { %1206 = vsyncadd (%p1610_p8), [#allocation6], 4294965248  ;;  %p1611_p13 = pmov %p1610_p8 }
  0x83   : > { %p1612_p6 = pmov %p1610_p8 }
  0x84   : > { %1208 = dma.done.wait (%p1611_p13), [#allocation9], 1024  }
  0x85   : > { %1210 = vsyncadd (%p1612_p6), [#allocation9], 4294966272  ;;  %v1237_v0 = vmov 0.0   ;;  %vm1238_vm0 = vmmov 0   ;;  %v1013_v1 = vld [vmem:[#allocation5] sm:$0xff]   ;;  %v1014_v2 = vld [vmem:[#allocation5 + $0x8] sm:$0xff]  }
  0x86   : > { %872 = vmatprep.subr.bf16.mxu0 %v1237_v0  ;;  %888 = vmatprep.mubr.msk.bf16.mxu0 %vm1238_vm0, %v1237_v0  ;;  %v1015_v3 = vld [vmem:[#allocation5 + $0x10] sm:$0xff]   ;;  %v1021_v4 = vld [vmem:[#allocation7] sm:$0xff]   ;;  %v1016_v5 = vld [vmem:[#allocation5 + $0x18] sm:$0xff]   ;;  %s813_s13 = sshll.u32 %s1479_s8, 3  ;;  %s842_s20 = sshll.u32 %s1301_s28, 7 }
  0x87   : > { %892 = vmatprep.subr.bf16.mxu1 %v1237_v0  ;;  %908 = vmatprep.mubr.msk.bf16.mxu1 %vm1238_vm0, %v1237_v0  ;;  %v1022_v6 = vld [vmem:[#allocation7 + $0x8] sm:$0xff]   ;;  %v1017_v7 = vld [vmem:[#allocation5 + $0x20] sm:$0xff]   ;;  %v1023_v8 = vld [vmem:[#allocation7 + $0x10] sm:$0xff]   ;;  %s337_s15 = scalar_lea.vmem [#allocation10], %s813_s13  ;;  %s1542_s21 = scalar_lea.hbm %s1593_s7, %s842_s20 }
  0x88   : > { %873 = vmatpush3.bf16.msra.mxu0 %v1013_v1  ;;  %893 = vmatpush3.bf16.msra.mxu1 %v1021_v4  ;;  %v1018_v9 = vld [vmem:[#allocation5 + $0x28] sm:$0xff]   ;;  %v1024_v10 = vld [vmem:[#allocation7 + $0x18] sm:$0xff]   ;;  %v1019_v11 = vld [vmem:[#allocation5 + $0x30] sm:$0xff]   ;;  %s701_s29 = sshll.u32 %s337_s15, 4  ;;  %s1239_s28 = smov [#allocation10]   ;;  %s1544_s29 = int_to_ptr.vmem [resolvable:$true] %s701_s29 }
  0x89   : > { %874 = vmatprep.subr.bf16.mxu0 %v1237_v0  ;;  %894 = vmatprep.subr.bf16.mxu1 %v1237_v0  ;;  %v1025_v12 = vld [vmem:[#allocation7 + $0x20] sm:$0xff]   ;;  %v1020_v13 = vld [vmem:[#allocation5 + $0x38] sm:$0xff]   ;;  %v1026_v14 = vld [vmem:[#allocation7 + $0x28] sm:$0xff]   ;;  %s1155_s30 = scalar_lea.vmem %s1544_s29, 128  ;;  %s1159_s9 = sshll.u32 %s1239_s28, 4  ;;  %s1160_s9 = int_to_ptr.vmem [resolvable:$false] %s1159_s9 }
  0x8a   : > { %v339_v15 = vld [vmem:[%s1483_s16] sm:$0xf]  ;;  %v1027_v16 = vld [vmem:[#allocation7 + $0x30] sm:$0xff]   ;;  %v1029_v18 = vld [vmem:[#allocation8] sm:$0xff]   ;;  %s688_s16 = scalar_lea.sflag [#allocation4], %s1479_s8  ;;  %p1156_p10 = scmp.ne.s32.totalorder %s1544_s29, %s1155_s30 }
  0x8b   : > { %v1028_v17 = vld [vmem:[#allocation7 + $0x38] sm:$0xff]   ;;  %v1030_v19 = vld [vmem:[#allocation8 + $0x8] sm:$0xff]   ;;  %v1031_v20 = vld [vmem:[#allocation8 + $0x10] sm:$0xff]   ;;  %s1161_s23 = scalar_lea.vmem %s1160_s9, 256  ;;  %p1162_p12 = scmp.lt.s32.totalorder %s1544_s29, %s1160_s9 }
  0x8c   : > { %875 = vmatpush3.bf16.msra.mxu0 %v1014_v2  ;;  %895 = vmatpush3.bf16.msra.mxu1 %v1022_v6  ;;  %v1032_v21 = vld [vmem:[#allocation8 + $0x18] sm:$0xff]   ;;  %v1033_v22 = vld [vmem:[#allocation8 + $0x20] sm:$0xff]   ;;  %v1034_v23 = vld [vmem:[#allocation8 + $0x28] sm:$0xff]   ;;  %p1157_p3 = pnand %p1156_p10, %p1434_p5  ;;  %p1163_p1 = scmp.lt.s32.totalorder %s1161_s23, %s1155_s30 }
  0x8d   : > { %876 = vmatprep.subr.bf16.mxu0 %v1237_v0  ;;  %896 = vmatprep.subr.bf16.mxu1 %v1237_v0  ;;  %v814_v24 = vld [vmem:[%s1588_s2] ss:$0 sm:$0xff]  ;;  %v1035_v31 = vld [vmem:[#allocation8 + $0x30] sm:$0xff]  }
  0x8e   : > { %v1036_v32 = vld [vmem:[#allocation8 + $0x38] sm:$0xff]   ;;  %p1158_p7 = pneg %p1157_p3  ;;  %p1164_p2 = por %p1163_p1, %p1162_p12 }
  0x8f   : > { %v823_v33 = vld [vmem:[%s1590_s4] ss:$0 sm:$0xff] }
  0x90   : > { %877 = vmatpush3.bf16.msra.mxu0 %v1015_v3  ;;  %897 = vmatpush3.bf16.msra.mxu1 %v1023_v8  ;;  %v832_v41 = vld [vmem:[%s1592_s6] ss:$0 sm:$0xff]  ;;  %p1165_p4 = pnand %p1164_p2, %p1158_p7 }
  0x91   : > { %878 = vmatprep.subr.bf16.mxu0 %v1237_v0  ;;  %898 = vmatprep.subr.bf16.mxu1 %v1237_v0 }
  0x94   : > { %879 = vmatpush3.bf16.msra.mxu0 %v1016_v5  ;;  %899 = vmatpush3.bf16.msra.mxu1 %v1024_v10 }
  0x95   : > { %880 = vmatprep.subr.bf16.mxu0 %v1237_v0  ;;  %900 = vmatprep.subr.bf16.mxu1 %v1237_v0 }
  0x98   : > { %881 = vmatpush3.bf16.msra.mxu0 %v1017_v7  ;;  %901 = vmatpush3.bf16.msra.mxu1 %v1025_v12 }
  0x99   : > { %882 = vmatprep.subr.bf16.mxu0 %v1237_v0  ;;  %902 = vmatprep.subr.bf16.mxu1 %v1237_v0 }
  0x9c   : > { %883 = vmatpush3.bf16.msra.mxu0 %v1018_v9  ;;  %903 = vmatpush3.bf16.msra.mxu1 %v1026_v14 }
  0x9d   : > { %884 = vmatprep.subr.bf16.mxu0 %v1237_v0  ;;  %904 = vmatprep.subr.bf16.mxu1 %v1237_v0 }
  0xa0   : > { %885 = vmatpush3.bf16.msra.mxu0 %v1019_v11  ;;  %905 = vmatpush3.bf16.msra.mxu1 %v1027_v16 }
  0xa1   : > { %886 = vmatprep.subr.bf16.mxu0 %v1237_v0  ;;  %906 = vmatprep.subr.bf16.mxu1 %v1237_v0 }
  0xa4   : > { %887 = vmatpush3.bf16.msra.mxu0 %v1020_v13  ;;  %907 = vmatpush3.bf16.msra.mxu1 %v1028_v17 }
  0xa5   : > { %912 = vmatprep.subr.bf16.mxu0 %v1237_v0 }
  0xa7   : > { %889 = vmatmul.mubr.bf16.vlgmr.msra.gmra.mrb[0].mxu0 %v339_v15 }
  0xa8   : > { %928 = vmatprep.mubr.msk.bf16.mxu0 %vm1238_vm0, %v1237_v0  ;;  %913 = vmatpush3.bf16.msra.mxu0 %v1029_v18 }
  0xa9   : > { %914 = vmatprep.subr.bf16.mxu0 %v1237_v0 }
  0xac   : > { %915 = vmatpush3.bf16.msra.mxu0 %v1030_v19 }
  0xad   : > { %916 = vmatprep.subr.bf16.mxu0 %v1237_v0 }
  0xb0   : > { %917 = vmatpush3.bf16.msra.mxu0 %v1031_v20 }
  0xb1   : > { %918 = vmatprep.subr.bf16.mxu0 %v1237_v0 }
  0xb4   : > { %919 = vmatpush3.bf16.msra.mxu0 %v1032_v21 }
  0xb5   : > { %920 = vmatprep.subr.bf16.mxu0 %v1237_v0 }
  0xb8   : > { %921 = vmatpush3.bf16.msra.mxu0 %v1033_v22 }
  0xb9   : > { %922 = vmatprep.subr.bf16.mxu0 %v1237_v0 }
  0xbc   : > { %923 = vmatpush3.bf16.msra.mxu0 %v1034_v23 }
  0xbd   : > { %924 = vmatprep.subr.bf16.mxu0 %v1237_v0 }
  0xc0   : > { %925 = vmatpush3.bf16.msra.mxu0 %v1035_v31 }
  0xc1   : > { %926 = vmatprep.subr.bf16.mxu0 %v1237_v0 }
  0xc4   : > { %927 = vmatpush3.bf16.msra.mxu0 %v1036_v32 }
 0x17a   : > { %v445_v25 = vpop.f32.mrb[0].mxu0 }
 0x17b   : > { %v446_v26 = vadd.f32 %v814_v24, %v445_v25  ;;  %v890_v27 = vpop.f32.mrb[1].mxu0 }
 0x17c   : > { %v448_v28 = vpop.f32.mrb[2].mxu0 }
 0x17d   : > { %v451_v29 = vpack.c.bf16 %v446_v26, %v446_v26  ;;  %v891_v30 = vpop.f32.mrb[3].mxu0 }
 0x17f   : > { %909 = vmatmul.mubr.bf16.vlgmr.msra.gmra.mrb[0].mxu1 %v451_v29 }
 0x252   : > { %v557_v34 = vpop.f32.mrb[0].mxu1 }
 0x253   : > { %v558_v35 = vadd.f32 %v823_v33, %v557_v34  ;;  %v910_v36 = vpop.f32.mrb[1].mxu1 }
 0x254   : > { %v560_v37 = vpop.f32.mrb[2].mxu1 }
 0x255   : > { %v563_v38 = vmax.f32 %v558_v35, 0.0  ;;  %v911_v39 = vpop.f32.mrb[3].mxu1 }
 0x257   : > { %v564_v40 = vpack.c.bf16 %v563_v38, %v563_v38 }
 0x259   : > { %929 = vmatmul.mubr.bf16.vlgmr.msra.gmra.mrb[4].mxu0 %v564_v40 }
 0x32c   : > { %v670_v42 = vpop.f32.mrb[4].mxu0 }
 0x32d   : > { %v671_v43 = vadd.f32 %v832_v41, %v670_v42  ;;  %v930_v44 = vpop.f32.mrb[5].mxu0 }
 0x32e   : > { %v673_v45 = vpop.f32.mrb[6].mxu0 }
 0x32f   : > { %676 = vmax.xlane.f32.xlu0 %v671_v43  ;;  %v931_v46 = vpop.f32.mrb[7].mxu0 }
 0x3bc   : > { %v677_v47 = vpop.xlane.xlu0 %676 }
 0x3bd   : > { %v678_v48 = vsub.f32 %v671_v43, %v677_v47 }
 0x3bf   : > { %v679_v49 = vmul.f32 1.442695, %v678_v48 }
 0x3c1   : > { %1037 = vpow2.f32 %v679_v49 }
 0x3cb   : > { %v1038_v50 = vpop.eup %1037 }
 0x3cc   : > { %681 = vadd.xlane.f32.xlu0 %v1038_v50 }
 0x459   : > { %v682_v51 = vpop.xlane.xlu0 %681 }
 0x45a   : > { %1039 = vlog2.f32 %v682_v51 }
 0x464   : > { %v1040_v52 = vpop.eup %1039 }
 0x465   : > { %v684_v53 = vmul.f32 0.6931472, %v1040_v52 }
 0x467   : > { %v685_v54 = vsub.f32 %v678_v48, %v684_v53 }
 0x469   : > { %686 = vst [vmem:[%s337_s15] sm:$0xff] %v685_v54 }
 0x46a   : > { %1168 = shalt.err (!%p1165_p4)
}
 0x46b   : > { %s1169_s8 = scalar_lea.hbm %s1542_s21, 128  ;;  %s1173_s14 = scalar_lea.hbm %s1593_s7, 256 }
 0x46c   : > { %p1170_p0 = scmp.ne.s32.totalorder %s1542_s21, %s1169_s8  ;;  %p1174_p8 = scmp.lt.u32.totalorder %s1542_s21, %s1593_s7 }
 0x46d   : > { %p1175_p13 = scmp.lt.u32.totalorder %s1173_s14, %s1169_s8  ;;  %p1177_p10 = scmp.lt.u32.totalorder %s1169_s8, %s1542_s21 }
 0x46e   : > { %p1171_p9 = pnand %p1170_p0, %p1434_p5 }
 0x46f   : > { %p1176_p6 = por %p1175_p13, %p1174_p8 }
 0x470   : > { %p1172_p11 = pneg %p1171_p9 }
 0x471   : > { %p1178_p3 = por %p1177_p10, %p1176_p6 }
 0x473   : > { %p1179_p7 = pnand %p1178_p3, %p1172_p11 }
 0x475   : > { %1182 = shalt.err (!%p1179_p7)
}
 0x476   : > { %946 = dma.vmem_to_hbm [thread:$0]  (%p1434_p5), %s1544_s29, 128, %s1542_s21, %s688_s16  }
 0x477 PF: > { %s1613_s15 = sld [smem:[#allocation15_spill]]  ;;  %s713_s12 = sand.u32 1, %s1217_s24  }
 0x478   : > { %p1615_p1 = scmp.ge.s32.totalorder %s1229_s27, 2  ;;  %s714_s17 = scalar_lea.sflag [#allocation4], %s713_s12 }
 0x47d   : > { %p1614_p12 = scmp.ne.s32.totalorder %s1613_s15, 0 }
 0x47f   : > { %p963_p2 = pnand %p1615_p1, %p1614_p12 }
 0x481   : > { %1212 = dma.done.wait (!%p963_p2), %s714_s17, 128  }
 0x482   : > { %1214 = vsyncadd (!%p963_p2), %s714_s17, 4294967168  ;;  %p22_p4 = scmp.ge.s32.totalorder %s1420_s22, 4   ;;  %s1616_s24 = smov %s1221_s25 }
 0x483   : > { %s1617_s25 = smov %s1225_s26  ;;  %s1618_s26 = smov %s1430_s18 }
 0x484   : > { %s1619_s27 = smov %s1420_s22  ;;  %24 = sbr.rel (!%p22_p4) target bundleno = 7 (0x7), region = 105 }
 0x48b   :  { %719 = vsyncpa [#allocation3], 1 }
 0x48c   :  { %721 = vsyncpa [#allocation3 + $0x1], 1 }
 0x48d   :  { %722 = vsyncpa [#allocation6], 1 }
 0x48e   :  { %723 = vsyncpa [#allocation9], 1 }
 0x48f   :  { %724 = vsyncpa [#allocation4], 1 }
 0x490   :  { %726 = vsyncpa [#allocation4 + $0x1], 1 }

</bundles_post_ra>
